<compile_context>
chip_gen: v7x
topology: tpu7x:2x2x1
jax: 0.10.0
libtpu: 0.0.40
codegen_flags: <defaults>
</compile_context>

<pallas_src>
import functools

import jax
import jax.numpy as jnp
from jax import lax
from jax.experimental import pallas as pl
from jax.experimental.pallas import tpu as pltpu

# ----------------------------- encoder config -------------------------------
EMBED_DIMS = [64, 128, 320, 512]
NUM_HEADS = [1, 2, 5, 8]
MLP_RATIOS = [4, 4, 4, 4]
SR_RATIOS = [8, 4, 2, 1]
DEPTHS = [3, 3, 6, 3]

_SQRT_HALF = 0.7071067811865476


def _round_up(x, m):
    return (x + m - 1) // m * m


def _pick_tile(dim, pref, align):
    """Return (tile, padded_dim) with tile | padded_dim and tile % align == 0."""
    if dim <= pref:
        p = _round_up(dim, align)
        return p, p
    return pref, _round_up(dim, pref)


# ----------------------------- Pallas kernels -------------------------------
def _erf_poly(x):
    # Abramowitz & Stegun 7.1.26 rational approximation (|err| < 1.5e-7).
    p = 0.3275911
    a1, a2, a3, a4, a5 = 0.254829592, -0.284496736, 1.421413741, -1.453152027, 1.061405429
    s = jnp.sign(x)
    ax = jnp.abs(x)
    t = 1.0 / (1.0 + p * ax)
    poly = ((((a5 * t + a4) * t + a3) * t + a2) * t + a1) * t
    return s * (1.0 - poly * jnp.exp(-ax * ax))


def _gelu(x):
    # TODO(synk): exact nn.GELU uses erf; polynomial approx (~1e-7 abs error).
    return 0.5 * x * (1.0 + _erf_poly(x * _SQRT_HALF))


# ------------------------------ tiled matmul ---------------------------------
def _matmul_kernel(x_ref, w_ref, b_ref, o_ref, acc_ref, *, act):
    @pl.when(pl.program_id(2) == 0)
    def _():
        acc_ref[...] = jnp.zeros_like(acc_ref)

    acc_ref[...] += jnp.dot(x_ref[...], w_ref[...], preferred_element_type=jnp.float32)

    @pl.when(pl.program_id(2) == pl.num_programs(2) - 1)
    def _():
        r = acc_ref[...] + b_ref[...]
        if act == "relu":
            r = jnp.maximum(r, 0.0)
        elif act == "gelu":
            r = _gelu(r)
        o_ref[...] = r.astype(o_ref.dtype)


@functools.partial(jax.jit, static_argnames=("act", "out_dtype"))
def pallas_matmul(x, w, b, act="none", out_dtype=jnp.bfloat16):
    """out = act(x @ w + b);  x:(M,K) w:(K,N) b:(N,).  bf16 MXU, f32 accumulate."""
    M, K = x.shape
    _, N = w.shape
    tm, Mp = _pick_tile(M, 256, 8)
    tn, Np = _pick_tile(N, 512, 128)
    tk, Kp = _pick_tile(K, 512, 128)
    xp = x.astype(jnp.bfloat16)
    wp = w.astype(jnp.bfloat16)
    if (Mp, Kp) != (M, K):
        xp = jnp.pad(xp, ((0, Mp - M), (0, Kp - K)))
    if (Kp, Np) != (K, N):
        wp = jnp.pad(wp, ((0, Kp - K), (0, Np - N)))
    bp = b.astype(jnp.float32)
    if Np != N:
        bp = jnp.pad(bp, ((0, Np - N),))
    bp = bp.reshape(1, Np)
    out = pl.pallas_call(
        functools.partial(_matmul_kernel, act=act),
        out_shape=jax.ShapeDtypeStruct((Mp, Np), out_dtype),
        grid_spec=pltpu.PrefetchScalarGridSpec(
            num_scalar_prefetch=0,
            grid=(Mp // tm, Np // tn, Kp // tk),
            in_specs=[
                pl.BlockSpec((tm, tk), lambda i, j, k: (i, k)),
                pl.BlockSpec((tk, tn), lambda i, j, k: (k, j)),
                pl.BlockSpec((1, tn), lambda i, j, k: (0, j)),
            ],
            out_specs=pl.BlockSpec((tm, tn), lambda i, j, k: (i, j)),
            scratch_shapes=[pltpu.VMEM((tm, tn), jnp.float32)],
        ),
        compiler_params=pltpu.CompilerParams(
            dimension_semantics=("parallel", "parallel", "arbitrary")),
    )(xp, wp, bp)
    if (Mp, Np) != (M, N):
        out = out[:M, :N]
    return out


# ------------------------------- layer norm ----------------------------------
def _layernorm_kernel(x_ref, g_ref, b_ref, o_ref, *, eps):
    x = x_ref[...].astype(jnp.float32)
    mu = jnp.mean(x, axis=-1, keepdims=True)
    d = x - mu
    var = jnp.mean(d * d, axis=-1, keepdims=True)
    inv = lax.rsqrt(var + eps)
    o_ref[...] = (d * inv * g_ref[...] + b_ref[...]).astype(o_ref.dtype)


@functools.partial(jax.jit, static_argnames=("eps", "out_dtype"))
def pallas_layernorm(x, gamma, beta, eps=1e-6, out_dtype=jnp.bfloat16):
    M, C = x.shape
    tm = min(256, _round_up(M, 8))
    Mp = _round_up(M, tm)
    xp = x if Mp == M else jnp.pad(x, ((0, Mp - M), (0, 0)))
    out = pl.pallas_call(
        functools.partial(_layernorm_kernel, eps=eps),
        out_shape=jax.ShapeDtypeStruct((Mp, C), out_dtype),
        grid=(Mp // tm,),
        in_specs=[pl.BlockSpec((tm, C), lambda i: (i, 0)),
                  pl.BlockSpec((1, C), lambda i: (0, 0)),
                  pl.BlockSpec((1, C), lambda i: (0, 0))],
        out_specs=pl.BlockSpec((tm, C), lambda i: (i, 0)),
        compiler_params=pltpu.CompilerParams(dimension_semantics=("parallel",)),
    )(xp, gamma.reshape(1, C).astype(jnp.float32),
      beta.reshape(1, C).astype(jnp.float32))
    return out if Mp == M else out[:M]


# ------------------------------- attention -----------------------------------
def _attn_kernel(q_ref, k_ref, v_ref, o_ref, *, scale):
    q = q_ref[0]                                   # (h, N, dh) bf16
    k = k_ref[0]                                   # (h, Nk, dh) bf16
    v = v_ref[0]
    s = jnp.einsum("hqd,hkd->hqk", q, k,
                   preferred_element_type=jnp.float32) * scale
    m = jnp.max(s, axis=-1, keepdims=True)
    p = jnp.exp(s - m)
    l = jnp.sum(p, axis=-1, keepdims=True)
    o = jnp.einsum("hqk,hkd->hqd", p.astype(v.dtype), v,
                   preferred_element_type=jnp.float32)
    o_ref[0] = (o * pl.reciprocal(l, approx=True)).astype(o_ref.dtype)


@functools.partial(jax.jit, static_argnames=("scale",))
def pallas_attention(q, k, v, scale):
    """q:(B,h,N,dh)  k,v:(B,h,Nk,dh) -> (B,h,N,dh); softmax over keys."""
    B, h, N, dh = q.shape
    Nk = k.shape[2]
    return pl.pallas_call(
        functools.partial(_attn_kernel, scale=scale),
        out_shape=jax.ShapeDtypeStruct((B, h, N, dh), jnp.bfloat16),
        grid=(B,),
        in_specs=[pl.BlockSpec((1, h, N, dh), lambda b: (b, 0, 0, 0)),
                  pl.BlockSpec((1, h, Nk, dh), lambda b: (b, 0, 0, 0)),
                  pl.BlockSpec((1, h, Nk, dh), lambda b: (b, 0, 0, 0))],
        out_specs=pl.BlockSpec((1, h, N, dh), lambda b: (b, 0, 0, 0)),
        compiler_params=pltpu.CompilerParams(dimension_semantics=("parallel",)),
    )(q, k, v)


# ---------------------- depthwise 3x3 conv + GELU ----------------------------
def _dwconv_kernel(x_ref, w_ref, b_ref, o_ref, *, H, W):
    cb = o_ref.shape[-1]
    xv = x_ref[0].astype(jnp.float32)              # (H+2, W+2, cb)
    wv = w_ref[...]                                # (9, cb) f32
    acc = jnp.zeros((H, W, cb), jnp.float32)
    for dy in range(3):
        for dx in range(3):
            acc = acc + xv[dy:dy + H, dx:dx + W, :] * wv[dy * 3 + dx].reshape(1, 1, cb)
    acc = acc + b_ref[0].reshape(1, 1, cb)
    o_ref[0] = _gelu(acc).astype(o_ref.dtype)


@jax.jit
def pallas_dwconv3x3_gelu(x, w9, bias):
    """Depthwise 3x3 conv (pad=1, stride=1) + bias + GELU.  x: (B,H,W,C)."""
    B, H, W, C = x.shape
    cb = 256 if C % 256 == 0 else (128 if C % 128 == 0 else C)
    xp = jnp.pad(x.astype(jnp.bfloat16), ((0, 0), (1, 1), (1, 1), (0, 0)))
    return pl.pallas_call(
        functools.partial(_dwconv_kernel, H=H, W=W),
        out_shape=jax.ShapeDtypeStruct((B, H, W, C), jnp.bfloat16),
        grid=(B, C // cb),
        in_specs=[pl.BlockSpec((1, H + 2, W + 2, cb), lambda b, c: (b, 0, 0, c)),
                  pl.BlockSpec((9, cb), lambda b, c: (0, c)),
                  pl.BlockSpec((1, cb), lambda b, c: (0, c))],
        out_specs=pl.BlockSpec((1, H, W, cb), lambda b, c: (b, 0, 0, c)),
        compiler_params=pltpu.CompilerParams(
            dimension_semantics=("parallel", "parallel")),
    )(xp, w9.astype(jnp.float32), bias.reshape(1, C).astype(jnp.float32))


# ------------------------------- |a - b| --------------------------------------
def _absdiff_kernel(a_ref, b_ref, o_ref):
    o_ref[...] = jnp.abs(a_ref[...] - b_ref[...])


@jax.jit
def pallas_absdiff(a, b):
    M, C = a.shape
    tm = min(256, _round_up(M, 8))
    Mp = _round_up(M, tm)
    if Mp != M:
        a = jnp.pad(a, ((0, Mp - M), (0, 0)))
        b = jnp.pad(b, ((0, Mp - M), (0, 0)))
    out = pl.pallas_call(
        _absdiff_kernel,
        out_shape=jax.ShapeDtypeStruct((Mp, C), jnp.bfloat16),
        grid=(Mp // tm,),
        in_specs=[pl.BlockSpec((tm, C), lambda i: (i, 0)),
                  pl.BlockSpec((tm, C), lambda i: (i, 0))],
        out_specs=pl.BlockSpec((tm, C), lambda i: (i, 0)),
        compiler_params=pltpu.CompilerParams(dimension_semantics=("parallel",)),
    )(a, b)
    return out if Mp == M else out[:M]


# ---------------------- direct (implicit-GEMM) stride-1 conv ------------------
def _convdirect_kernel(x_ref, w_ref, b_ref, o_ref, *, kh, kw, Ho, Wo, act):
    Cin = x_ref.shape[-1]
    Cout = o_ref.shape[-1]
    x = x_ref[0]                                   # (Hp, Wp, Cin) bf16
    acc = jnp.zeros((Ho * Wo, Cout), jnp.float32)
    for dy in range(kh):
        for dx in range(kw):
            tap = x[dy:dy + Ho, dx:dx + Wo, :].reshape(Ho * Wo, Cin)
            acc = acc + jnp.dot(tap, w_ref[dy * kw + dx],
                                preferred_element_type=jnp.float32)
    acc = acc + b_ref[0]
    if act == "relu":
        acc = jnp.maximum(acc, 0.0)
    elif act == "gelu":
        acc = _gelu(acc)
    o_ref[0] = acc.reshape(Ho, Wo, Cout).astype(o_ref.dtype)


def _conv2d_s1_direct(x, w, b, padding, act, out_dtype):
    B, H, W, Cin = x.shape
    Cout, _, kh, kw = w.shape
    xp = x.astype(jnp.bfloat16)
    if padding:
        xp = jnp.pad(xp, ((0, 0), (padding, padding), (padding, padding), (0, 0)))
    Hp, Wp = H + 2 * padding, W + 2 * padding
    Ho, Wo = Hp - kh + 1, Wp - kw + 1
    wt = jnp.transpose(w, (2, 3, 1, 0)).reshape(kh * kw, Cin, Cout).astype(jnp.bfloat16)
    return pl.pallas_call(
        functools.partial(_convdirect_kernel, kh=kh, kw=kw, Ho=Ho, Wo=Wo, act=act),
        out_shape=jax.ShapeDtypeStruct((B, Ho, Wo, Cout), out_dtype),
        grid=(B,),
        in_specs=[pl.BlockSpec((1, Hp, Wp, Cin), lambda bi: (bi, 0, 0, 0)),
                  pl.BlockSpec((kh * kw, Cin, Cout), lambda bi: (0, 0, 0)),
                  pl.BlockSpec((1, Cout), lambda bi: (0, 0))],
        out_specs=pl.BlockSpec((1, Ho, Wo, Cout), lambda bi: (bi, 0, 0, 0)),
        compiler_params=pltpu.CompilerParams(dimension_semantics=("parallel",)),
    )(xp, wt, b.astype(jnp.float32).reshape(1, Cout))


@functools.partial(jax.jit, static_argnames=("stride", "padding", "act", "out_dtype"))
def conv2d(x, w, b, stride, padding, act="none", out_dtype=jnp.bfloat16):
    """x: NHWC; w: PyTorch OIHW (Cout, Cin, kh, kw); zero padding."""
    B, H, W, Cin = x.shape
    Cout, _, kh, kw = w.shape
    Hp, Wp = H + 2 * padding, W + 2 * padding
    # Stride-1 convs (decoder residual blocks, cp head): direct kernel, no im2col.
    if (stride == 1 and Hp * Wp * Cin * 2 <= (6 << 20)
            and kh * kw * Cin * Cout * 2 <= (6 << 20)):
        return _conv2d_s1_direct(x, w, b, padding, act, out_dtype)
    # Strided convs (patch embeds / sr reduction): im2col (bf16) + MXU matmul.
    xp = x.astype(jnp.bfloat16)
    if padding:
        xp = jnp.pad(xp, ((0, 0), (padding, padding), (padding, padding), (0, 0)))
    Ho = (Hp - kh) // stride + 1
    Wo = (Wp - kw) // stride + 1
    cols = []
    for i in range(kh):
        for j in range(kw):
            cols.append(xp[:, i:i + stride * (Ho - 1) + 1:stride,
                              j:j + stride * (Wo - 1) + 1:stride, :])
    patches = jnp.concatenate(cols, axis=-1)                 # (B,Ho,Wo,kh*kw*Cin)
    wcol = jnp.transpose(w, (2, 3, 1, 0)).reshape(kh * kw * Cin, Cout)
    y = pallas_matmul(patches.reshape(B * Ho * Wo, kh * kw * Cin), wcol, b,
                      act=act, out_dtype=out_dtype)
    return y.reshape(B, Ho, Wo, Cout)


# ----------------- phase-decomposed ConvTranspose2d(k=4, s=2, p=1) ------------
def _deconv_kernel(x_ref, w_ref, b_ref, o_ref, *, H, W):
    Cin = x_ref.shape[-1]
    Cout = o_ref.shape[-1]
    x = x_ref[0]                                   # (H+2, W+2, Cin) bf16
    bias = b_ref[0].astype(jnp.float32)
    for p in range(4):
        ry, rx = p // 2, p % 2
        acc = jnp.zeros((H * W, Cout), jnp.float32)
        for dy in range(2):
            for dx in range(2):
                tap = x[ry + dy:ry + dy + H, rx + dx:rx + dx + W, :].reshape(H * W, Cin)
                acc = acc + jnp.dot(tap, w_ref[p, dy * 2 + dx],
                                    preferred_element_type=jnp.float32)
        acc = acc + bias
        o_ref[0, p] = acc.reshape(H, W, Cout).astype(o_ref.dtype)


@functools.partial(jax.jit, static_argnames=("out_dtype",))
def conv_transpose2d(x, w, b, out_dtype=jnp.bfloat16):
    """PyTorch ConvTranspose2d(4, stride=2, pad=1) as 4 sub-pixel 2x2 convs.
    x: NHWC, w: (Cin, Cout, 4, 4)."""
    B, H, W, Cin = x.shape
    Cout = w.shape[1]
    xp = jnp.pad(x.astype(jnp.bfloat16), ((0, 0), (1, 1), (1, 1), (0, 0)))
    wt = jnp.transpose(w, (2, 3, 0, 1))            # (ky, kx, Cin, Cout)
    phases = []
    for ry in range(2):
        for rx in range(2):
            taps = [wt[3 - ry - 2 * dy, 3 - rx - 2 * dx]
                    for dy in range(2) for dx in range(2)]
            phases.append(jnp.stack(taps, axis=0))           # (4, Cin, Cout)
    w_phase = jnp.stack(phases, axis=0).astype(jnp.bfloat16)  # (4, 4, Cin, Cout)
    out = pl.pallas_call(
        functools.partial(_deconv_kernel, H=H, W=W),
        out_shape=jax.ShapeDtypeStruct((B, 4, H, W, Cout), out_dtype),
        grid=(B,),
        in_specs=[pl.BlockSpec((1, H + 2, W + 2, Cin), lambda bi: (bi, 0, 0, 0)),
                  pl.BlockSpec((4, 4, Cin, Cout), lambda bi: (0, 0, 0, 0)),
                  pl.BlockSpec((1, Cout), lambda bi: (0, 0))],
        out_specs=pl.BlockSpec((1, 4, H, W, Cout), lambda bi: (bi, 0, 0, 0, 0)),
        compiler_params=pltpu.CompilerParams(dimension_semantics=("parallel",)),
    )(xp, w_phase, b.astype(jnp.float32).reshape(1, Cout))
    # interleave: y[b, 2m+ry, 2n+rx, c] = out[b, ry*2+rx, m, n, c]
    out = out.reshape(B, 2, 2, H, W, Cout)
    return jnp.transpose(out, (0, 3, 1, 4, 2, 5)).reshape(B, 2 * H, 2 * W, Cout)


# ------------------------------- model glue ----------------------------------
def attn_forward(x, H, W, p, num_heads, sr):
    B, N, C = x.shape
    dh = C // num_heads
    scale = dh ** -0.5
    q = pallas_matmul(x.reshape(B * N, C), p["q_w"], p["q_b"]).reshape(B, N, C)
    if sr > 1:
        x_img = x.reshape(B, H, W, C)
        x_sr = conv2d(x_img, p["sr_w"], p["sr_b"], stride=sr, padding=0)
        Nk = x_sr.shape[1] * x_sr.shape[2]
        xk = pallas_layernorm(x_sr.reshape(B * Nk, C), p["srn_g"], p["srn_b"], eps=1e-5)
    else:
        Nk = N
        xk = x.reshape(B * N, C)
    kv = pallas_matmul(xk, p["kv_w"], p["kv_b"]).reshape(B, Nk, 2 * C)
    k, v = kv[..., :C], kv[..., C:]
    qh = q.reshape(B, N, num_heads, dh).transpose(0, 2, 1, 3)
    kh = k.reshape(B, Nk, num_heads, dh).transpose(0, 2, 1, 3)
    vh = v.reshape(B, Nk, num_heads, dh).transpose(0, 2, 1, 3)
    oh = pallas_attention(qh, kh, vh, scale=scale)           # (B, h, N, dh)
    o = oh.transpose(0, 2, 1, 3).reshape(B, N, C)
    return pallas_matmul(o.reshape(B * N, C), p["proj_w"], p["proj_b"]).reshape(B, N, C)


def mlp_forward(x, H, W, p):
    B, N, C = x.shape
    h = pallas_matmul(x.reshape(B * N, C), p["fc1_w"], p["fc1_b"])
    hidden = h.shape[-1]
    h = pallas_dwconv3x3_gelu(h.reshape(B, H, W, hidden), p["dw_w"], p["dw_b"])
    h = h.reshape(B * N, hidden)
    return pallas_matmul(h, p["fc2_w"], p["fc2_b"]).reshape(B, N, C)


@functools.partial(jax.jit, static_argnames=("H", "W", "num_heads", "sr"))
def block_forward(x, p, H, W, num_heads, sr):
    # Dropout / DropPath are identity at inference.
    B, N, C = x.shape
    h = pallas_layernorm(x.reshape(B * N, C), p["n1_g"], p["n1_b"], eps=1e-6).reshape(B, N, C)
    x = x + attn_forward(h, H, W, p["attn"], num_heads, sr)
    h = pallas_layernorm(x.reshape(B * N, C), p["n2_g"], p["n2_b"], eps=1e-6).reshape(B, N, C)
    x = x + mlp_forward(h, H, W, p["mlp"])
    return x


def tenc_forward(enc_params, x_nhwc):
    B = x_nhwc.shape[0]
    outs = []
    x_img = x_nhwc
    for si in range(4):
        st = enc_params[si]
        k, s, pd = (7, 4, 3) if si == 0 else (3, 2, 1)
        y = conv2d(x_img, st["patch"]["w"], st["patch"]["b"], stride=s, padding=pd)
        _, H, W, C = y.shape
        tok = pallas_layernorm(y.reshape(B * H * W, C),
                               st["patch"]["ln_g"], st["patch"]["ln_b"], eps=1e-5)
        tok = tok.reshape(B, H * W, C)
        for blk in st["blocks"]:
            tok = block_forward(tok, blk, H=H, W=W,
                                num_heads=NUM_HEADS[si], sr=SR_RATIOS[si])
        tok = pallas_layernorm(tok.reshape(B * H * W, C),
                               st["norm_g"], st["norm_b"], eps=1e-6)
        x_img = tok.reshape(B, H, W, C)
        outs.append(x_img)
    return outs


def residual_block(x, p):
    out = conv2d(x, p["c1_w"], p["c1_b"], stride=1, padding=1, act="relu")
    out = conv2d(out, p["c2_w"], p["c2_b"], stride=1, padding=1, act="none") * 0.1
    return out + x


def convprojection_forward(dec, DI):
    res16x = conv_transpose2d(DI[3], dec["convd16x"]["w"], dec["convd16x"]["b"])
    # Reference has F.pad shape-fix branches; they never trigger for H,W % 32 == 0.
    res8x = residual_block(res16x, dec["dense_4"]) + DI[2]
    res8x = conv_transpose2d(res8x, dec["convd8x"]["w"], dec["convd8x"]["b"])
    res4x = residual_block(res8x, dec["dense_3"]) + DI[1]
    res4x = conv_transpose2d(res4x, dec["convd4x"]["w"], dec["convd4x"]["b"])
    res2x = residual_block(res4x, dec["dense_2"]) + DI[0]
    res2x = conv_transpose2d(res2x, dec["convd2x"]["w"], dec["convd2x"]["b"])
    x = residual_block(res2x, dec["dense_1"])
    x = conv_transpose2d(x, dec["convd1x"]["w"], dec["convd1x"]["b"])
    return x


def change_former_v1_forward(params, inputs):
    x1 = jnp.transpose(inputs["img_1"], (0, 2, 3, 1)).astype(jnp.bfloat16)
    x2 = jnp.transpose(inputs["img_2"], (0, 2, 3, 1)).astype(jnp.bfloat16)
    fx1 = tenc_forward(params["enc"], x1)
    fx2 = tenc_forward(params["enc"], x2)
    DI = []
    for i in range(4):
        a, b = fx1[i], fx2[i]
        Bq, H, W, C = a.shape
        di = pallas_absdiff(a.reshape(Bq * H * W, C),
                            b.reshape(Bq * H * W, C)).reshape(Bq, H, W, C)
        DI.append(di)
    cp = convprojection_forward(params["dec"], DI)
    cp = conv2d(cp, params["cp"]["w"], params["cp"]["b"], stride=1, padding=1,
                out_dtype=jnp.float32)
    return jnp.transpose(cp, (0, 3, 1, 2)).astype(jnp.float32)  # (B, output_nc, H, W)


# ------------------------- deterministic parameters --------------------------
class ParamGen:
    def __init__(self, seed):
        self._key = jax.random.PRNGKey(seed)
        self._n = 0

    def normal(self, shape, scale=0.02):
        self._n += 1
        return scale * jax.random.normal(jax.random.fold_in(self._key, self._n),
                                         shape, dtype=jnp.float32)

    def zeros(self, shape):
        return jnp.zeros(shape, jnp.float32)

    def ones(self, shape):
        return jnp.ones(shape, jnp.float32)


def _resblock_params(pg, ch):
    return {"c1_w": pg.normal((ch, ch, 3, 3)), "c1_b": pg.zeros((ch,)),
            "c2_w": pg.normal((ch, ch, 3, 3)), "c2_b": pg.zeros((ch,))}


def init_params(seed=0, input_nc=3, output_nc=2):
    pg = ParamGen(seed)
    enc = []
    in_ch = input_nc
    for si in range(4):
        C = EMBED_DIMS[si]
        hidden = C * MLP_RATIOS[si]
        k = 7 if si == 0 else 3
        stage = {"patch": {"w": pg.normal((C, in_ch, k, k)), "b": pg.zeros((C,)),
                           "ln_g": pg.ones((C,)), "ln_b": pg.zeros((C,))},
                 "blocks": [],
                 "norm_g": pg.ones((C,)), "norm_b": pg.zeros((C,))}
        for _ in range(DEPTHS[si]):
            attn = {"q_w": pg.normal((C, C)), "q_b": pg.zeros((C,)),
                    "kv_w": pg.normal((C, 2 * C)), "kv_b": pg.zeros((2 * C,)),
                    "proj_w": pg.normal((C, C)), "proj_b": pg.zeros((C,))}
            if SR_RATIOS[si] > 1:
                sr = SR_RATIOS[si]
                attn.update({"sr_w": pg.normal((C, C, sr, sr)), "sr_b": pg.zeros((C,)),
                             "srn_g": pg.ones((C,)), "srn_b": pg.zeros((C,))})
            blk = {"n1_g": pg.ones((C,)), "n1_b": pg.zeros((C,)),
                   "n2_g": pg.ones((C,)), "n2_b": pg.zeros((C,)),
                   "attn": attn,
                   "mlp": {"fc1_w": pg.normal((C, hidden)), "fc1_b": pg.zeros((hidden,)),
                           "dw_w": pg.normal((9, hidden)), "dw_b": pg.zeros((hidden,)),
                           "fc2_w": pg.normal((hidden, C)), "fc2_b": pg.zeros((C,))}}
            stage["blocks"].append(blk)
        enc.append(stage)
        in_ch = C
    dec = {"convd16x": {"w": pg.normal((512, 320, 4, 4)), "b": pg.zeros((320,))},
           "dense_4": _resblock_params(pg, 320),
           "convd8x": {"w": pg.normal((320, 128, 4, 4)), "b": pg.zeros((128,))},
           "dense_3": _resblock_params(pg, 128),
           "convd4x": {"w": pg.normal((128, 64, 4, 4)), "b": pg.zeros((64,))},
           "dense_2": _resblock_params(pg, 64),
           "convd2x": {"w": pg.normal((64, 16, 4, 4)), "b": pg.zeros((16,))},
           "dense_1": _resblock_params(pg, 16),
           "convd1x": {"w": pg.normal((16, 8, 4, 4)), "b": pg.zeros((8,))}}
    cp = {"w": pg.normal((output_nc, 8, 3, 3)), "b": pg.zeros((output_nc,))}
    return {"enc": enc, "dec": dec, "cp": cp}


# ----------------------------------- main ------------------------------------
if __name__ == "__main__":
    key = jax.random.PRNGKey(0)
    k1, k2 = jax.random.split(key)
    B, H, W = 2, 64, 64   # H, W divisible by 32 (4 downsampling stages)
    inputs = {"img_1": jax.random.normal(k1, (B, 3, H, W), dtype=jnp.float32),
              "img_2": jax.random.normal(k2, (B, 3, H, W), dtype=jnp.float32)}
    params = init_params(seed=0, input_nc=3, output_nc=2)

    out = change_former_v1_forward(params, inputs)
    out = jax.block_until_ready(out)

    assert out.shape == (B, 2, H, W), out.shape
    assert bool(jnp.all(jnp.isfinite(out)))
    print("KERNEL_OK")
</pallas_src>

<mosaic_0001>
module attributes {stable_mosaic.version = 11 : i64} {
  func.func @_matmul_kernel(%arg0: i32, %arg1: i32, %arg2: i32, %arg3: memref<256x256xbf16, #tpu.memory_space<vmem>>, %arg4: memref<256x128xbf16, #tpu.memory_space<vmem>>, %arg5: memref<1x128xf32, #tpu.memory_space<vmem>>, %arg6: memref<256x128xbf16, #tpu.memory_space<vmem>>, %arg7: memref<256x128xf32, #tpu.memory_space<vmem>>) attributes {dimension_semantics = [#tpu.dimension_semantics<parallel>, #tpu.dimension_semantics<parallel>, #tpu.dimension_semantics<arbitrary>], iteration_bounds = array<i64: 2, 1, 1>, scalar_prefetch = 0 : i64, scratch_operands = 1 : i64, tpu.core_type = #tpu.core_type<tc>, window_params = [{transform_indices = @transform_0, window_bounds = array<i64: 256, 256>}, {transform_indices = @transform_1, window_bounds = array<i64: 256, 128>}, {transform_indices = @transform_2, window_bounds = array<i64: 1, 128>}, {transform_indices = @transform_3, window_bounds = array<i64: 256, 128>}]} {
    %c0_i32 = arith.constant 0 : i32
    %0 = arith.cmpi eq, %arg2, %c0_i32 : i32
    %1 = arith.extui %0 : i1 to i32
    %c0_i32_0 = arith.constant 0 : i32
    %2 = arith.cmpi ne, %1, %c0_i32_0 : i32
    scf.if %2 {
      %cst_10 = arith.constant 0.000000e+00 : f32
      %12 = vector.broadcast %cst_10 : f32 to vector<256x128xf32>
      %c0_11 = arith.constant 0 : index
      %c0_12 = arith.constant 0 : index
      %13 = vector.load %arg7[%c0_11, %c0_12] : memref<256x128xf32, #tpu.memory_space<vmem>>, vector<256x128xf32>
      tpu.vector_store %arg7[%c0_11, %c0_12], %12 {strides = array<i32>} : memref<256x128xf32, #tpu.memory_space<vmem>>, vector<256x128xf32>,
    } else {
    }
    %c0 = arith.constant 0 : index
    %c0_1 = arith.constant 0 : index
    %3 = vector.load %arg7[%c0, %c0_1] : memref<256x128xf32, #tpu.memory_space<vmem>>, vector<256x128xf32>
    %c0_2 = arith.constant 0 : index
    %c0_3 = arith.constant 0 : index
    %4 = vector.load %arg3[%c0_2, %c0_3] : memref<256x256xbf16, #tpu.memory_space<vmem>>, vector<256x256xbf16>
    %c0_4 = arith.constant 0 : index
    %c0_5 = arith.constant 0 : index
    %5 = vector.load %arg4[%c0_4, %c0_5] : memref<256x128xbf16, #tpu.memory_space<vmem>>, vector<256x128xbf16>
    %cst = arith.constant dense<0.000000e+00> : vector<256x128xf32>
    %6 = tpu.matmul %4, %5, %cst {dimension_numbers = #tpu.dot_dimension_numbers<[1], [0], [0], [1], [0, 0, 1, 1], [], []>} : vector<256x256xbf16>, vector<256x128xbf16>, vector<256x128xf32> -> vector<256x128xf32>
    %7 = arith.addf %3, %6 : vector<256x128xf32>
    %c0_6 = arith.constant 0 : index
    %c0_7 = arith.constant 0 : index
    %8 = vector.load %arg7[%c0_6, %c0_7] : memref<256x128xf32, #tpu.memory_space<vmem>>, vector<256x128xf32>
    tpu.vector_store %arg7[%c0_6, %c0_7], %7 {strides = array<i32>} : memref<256x128xf32, #tpu.memory_space<vmem>>, vector<256x128xf32>,
    %c0_i32_8 = arith.constant 0 : i32
    %9 = arith.cmpi eq, %arg2, %c0_i32_8 : i32
    %10 = arith.extui %9 : i1 to i32
    %c0_i32_9 = arith.constant 0 : i32
    %11 = arith.cmpi ne, %10, %c0_i32_9 : i32
    scf.if %11 {
      %c0_10 = arith.constant 0 : index
      %c0_11 = arith.constant 0 : index
      %12 = vector.load %arg7[%c0_10, %c0_11] : memref<256x128xf32, #tpu.memory_space<vmem>>, vector<256x128xf32>
      %c0_12 = arith.constant 0 : index
      %c0_13 = arith.constant 0 : index
      %13 = vector.load %arg5[%c0_12, %c0_13] : memref<1x128xf32, #tpu.memory_space<vmem>>, vector<1x128xf32>
      %14 = vector.broadcast %13 : vector<1x128xf32> to vector<256x128xf32>
      %15 = arith.addf %12, %14 : vector<256x128xf32>
      %16 = arith.truncf %15 : vector<256x128xf32> to vector<256x128xbf16>
      %c0_14 = arith.constant 0 : index
      %c0_15 = arith.constant 0 : index
      %17 = vector.load %arg6[%c0_14, %c0_15] : memref<256x128xbf16, #tpu.memory_space<vmem>>, vector<256x128xbf16>
      tpu.vector_store %arg6[%c0_14, %c0_15], %16 {strides = array<i32>} : memref<256x128xbf16, #tpu.memory_space<vmem>>, vector<256x128xbf16>,
    } else {
    }
    return
  }
  func.func @transform_0(%arg0: i32, %arg1: i32, %arg2: i32) -> (i32, i32) {
    %c0_i32 = arith.constant 0 : i32
    return %arg0, %arg2 : i32, i32
  }
  func.func @transform_1(%arg0: i32, %arg1: i32, %arg2: i32) -> (i32, i32) {
    %c0_i32 = arith.constant 0 : i32
    return %arg2, %arg1 : i32, i32
  }
  func.func @transform_2(%arg0: i32, %arg1: i32, %arg2: i32) -> (i32, i32) {
    %c0_i32 = arith.constant 0 : i32
    %c0_i32_0 = arith.constant 0 : i32
    return %c0_i32, %arg1 : i32, i32
  }
  func.func @transform_3(%arg0: i32, %arg1: i32, %arg2: i32) -> (i32, i32) {
    %c0_i32 = arith.constant 0 : i32
    return %arg0, %arg1 : i32, i32
  }
}

</mosaic_0001>

<bundles_post_ra>
// kernel: pallas_matmul.1
= control target key start
LH: loop header
LB: loop body
LE: loop exit
PB: predicated region body
PF: predicated region fallthrough
CT: control target
= control target key end

     0   :  { %s1712_s12 = smov 0   ;;  %s1714_s13 = smov 0   ;;  %s1886_s0 = inlined_call_operand.vmem [shape: bf16[512,256], index: 0, kind: input, shape index: {}]   ;;  %s1887_s1 = inlined_call_operand.vmem [shape: bf16[256,128], index: 1, kind: input, shape index: {}]   ;;  %s1888_s2 = inlined_call_operand.vmem [shape: f32[1,128], index: 2, kind: input, shape index: {}]   ;;  %s1889_s3 = inlined_call_operand.vmem [shape: bf16[512,128], index: 3, kind: output, shape index: {}]  }
   0x1   :  { %s1716_s14 = smov 0  }
   0x2 LB: > { %s32_s15 = sadd.s32 1, %s1686_s13  ;;  %p1235_p0 = scmp.ge.s32.totalorder %s1690_s14, 1  ;;  %s1690_s14 = sphi %s1716_s14, %s13_s14   ;;  %s1686_s13 = sphi %s1714_s13, %s1891_s13   ;;  %s1682_s12 = sphi %s1712_s12, %s1890_s12  }
   0x3   : > { %p34_p1 = scmp.ge.s32.totalorder %s32_s15, 2  ;;  %p191_p2 = scmp.lt.s32.totalorder %s1690_s14, 3 }
   0x5   : > { %s1893_s15 = smov (%p34_p1, %s32_s15), 0  ;;  %p192_p3 = pnand %p1235_p0, %p191_p2 }
   0x6   : > { %v1604_v0 = vld [vmem:[%s1887_s1 + $0x40] sm:$0xff] (!%p192_p3)   ;;  %s1236_s18 = sshll.u32 (!%p192_p3), %s1682_s12, 5  ;;  %v1606_v2 = vld [vmem:[%s1887_s1 + $0x48] sm:$0xff] (!%p192_p3)   ;;  %v1608_v4 = vld [vmem:[%s1887_s1 + $0x50] sm:$0xff] (!%p192_p3)  }
   0x7   : > { %195 = sbr.rel (%p192_p3) target bundleno = 317 (0x13d), region = 32  ;;  %v1605_v1 = vld [vmem:[%s1887_s1] sm:$0xff] (!%p192_p3)   ;;  %1452 = vmatprep.subr.bf16.mxu0 (!%p192_p3), %v1604_v0  ;;  %1564 = vmatprep.subr.bf16.mxu1 (!%p192_p3), %v1604_v0  ;;  %v1607_v3 = vld [vmem:[%s1887_s1 + $0x8] sm:$0xff] (!%p192_p3)   ;;  %p236_p4 = scmp.lt.s32.totalorder (!%p192_p3), %s1236_s18, 63  ;;  %v1609_v5 = vld [vmem:[%s1887_s1 + $0x10] sm:$0xff] (!%p192_p3)  }
   0x8   : > { %1453 = vmatpush3.bf16.msra.mxu0 (!%p192_p3), %v1605_v1  ;;  %1572 = vmatpush3.bf16.msra.mxu1 (!%p192_p3), %v1605_v1  ;;  %v1610_v6 = vld [vmem:[%s1887_s1 + $0x58] sm:$0xff] (!%p192_p3)   ;;  %v1612_v8 = vld [vmem:[%s1887_s1 + $0x60] sm:$0xff] (!%p192_p3)   ;;  %v1614_v10 = vld [vmem:[%s1887_s1 + $0x68] sm:$0xff] (!%p192_p3)  }
   0x9   : > { %1454 = vmatprep.subr.bf16.mxu0 (!%p192_p3), %v1606_v2  ;;  %1565 = vmatprep.subr.bf16.mxu1 (!%p192_p3), %v1606_v2  ;;  %v1611_v7 = vld [vmem:[%s1887_s1 + $0x18] sm:$0xff] (!%p192_p3)   ;;  %v1613_v9 = vld [vmem:[%s1887_s1 + $0x20] sm:$0xff] (!%p192_p3)   ;;  %v1615_v13 = vld [vmem:[%s1887_s1 + $0x28] sm:$0xff] (!%p192_p3)  }
   0xa   : > { %v1616_v14 = vld [vmem:[%s1887_s1 + $0x70] sm:$0xff] (!%p192_p3)   ;;  %v1618_v16 = vld [vmem:[%s1887_s1 + $0x78] sm:$0xff] (!%p192_p3)   ;;  %v1821_v56 = vld [vmem:[%s1888_s2] ss:$0 sm:$0xff] (!%p192_p3) }
   0xb   : > { %v1617_v15 = vld [vmem:[%s1887_s1 + $0x30] sm:$0xff] (!%p192_p3)   ;;  %v1619_v17 = vld [vmem:[%s1887_s1 + $0x38] sm:$0xff] (!%p192_p3)  }
   0xc   : > { %1455 = vmatpush3.bf16.msra.mxu0 (!%p192_p3), %v1607_v3  ;;  %1573 = vmatpush3.bf16.msra.mxu1 (!%p192_p3), %v1607_v3 }
   0xd   : > { %1456 = vmatprep.subr.bf16.mxu0 (!%p192_p3), %v1608_v4  ;;  %1566 = vmatprep.subr.bf16.mxu1 (!%p192_p3), %v1608_v4 }
   0xe   : > { %s1895_s18 = smov (!%p236_p4, %s1236_s18), 63 }
   0xf   : > { %s1324_s6 = sshll.u32 %s1895_s18, 3  ;;  %s1240_s5 = sshll.u32 %s1895_s18, 2 }
  0x10   : > { %1457 = vmatpush3.bf16.msra.mxu0 %v1609_v5  ;;  %1574 = vmatpush3.bf16.msra.mxu1 %v1609_v5  ;;  %s1763_s11 = scalar_lea.vmem %s1886_s0, %s1324_s6  ;;  %s1831_s8 = scalar_lea.vmem %s1889_s3, %s1240_s5 }
  0x11   : > { %1458 = vmatprep.subr.bf16.mxu0 %v1610_v6  ;;  %1567 = vmatprep.subr.bf16.mxu1 %v1610_v6  ;;  %v1622_v11 = vld [vmem:[%s1763_s11 + $0x4] ss:$8 sps:$4 sm:$0xff]   ;;  %v1620_v18 = vld [vmem:[%s1763_s11] ss:$8 sps:$4 sm:$0xff]   ;;  %v1626_v20 = vld [vmem:[%s1763_s11 + $0x14] ss:$8 sps:$4 sm:$0xff]  }
  0x12   : > { %v1625_v12 = vld [vmem:[%s1763_s11 + $0x84] ss:$8 sps:$4 sm:$0xff]   ;;  %688 = vmatprep.mubr.bf16.mxu0 %v1622_v11  ;;  %v1623_v19 = vld [vmem:[%s1763_s11 + $0x80] ss:$8 sps:$4 sm:$0xff]   ;;  %v1628_v21 = vld [vmem:[%s1763_s11 + $0x94] ss:$8 sps:$4 sm:$0xff]  }
  0x13   : > { %752 = vmatprep.mubr.bf16.mxu1 %v1625_v12  ;;  %v1630_v22 = vld [vmem:[%s1763_s11 + $0x10] ss:$8 sps:$4 sm:$0xff]   ;;  %v1632_v24 = vld [vmem:[%s1763_s11 + $0x24] ss:$8 sps:$4 sm:$0xff]   ;;  %v1636_v26 = vld [vmem:[%s1763_s11 + $0x20] ss:$8 sps:$4 sm:$0xff]  }
  0x14   : > { %1459 = vmatpush3.bf16.msra.mxu0 %v1611_v7  ;;  %1575 = vmatpush3.bf16.msra.mxu1 %v1611_v7  ;;  %v1631_v23 = vld [vmem:[%s1763_s11 + $0x90] ss:$8 sps:$4 sm:$0xff]   ;;  %v1634_v25 = vld [vmem:[%s1763_s11 + $0xa4] ss:$8 sps:$4 sm:$0xff]   ;;  %v1637_v27 = vld [vmem:[%s1763_s11 + $0xa0] ss:$8 sps:$4 sm:$0xff]  }
  0x15   : > { %1460 = vmatprep.subr.bf16.mxu0 %v1612_v8  ;;  %1568 = vmatprep.subr.bf16.mxu1 %v1612_v8  ;;  %v1638_v28 = vld [vmem:[%s1763_s11 + $0x34] ss:$8 sps:$4 sm:$0xff]   ;;  %v1642_v30 = vld [vmem:[%s1763_s11 + $0x30] ss:$8 sps:$4 sm:$0xff]   ;;  %v1644_v32 = vld [vmem:[%s1763_s11 + $0x44] ss:$8 sps:$4 sm:$0xff]  }
  0x16   : > { %v1640_v29 = vld [vmem:[%s1763_s11 + $0xb4] ss:$8 sps:$4 sm:$0xff]   ;;  %v1643_v31 = vld [vmem:[%s1763_s11 + $0xb0] ss:$8 sps:$4 sm:$0xff]   ;;  %v1646_v33 = vld [vmem:[%s1763_s11 + $0xc4] ss:$8 sps:$4 sm:$0xff]  }
  0x17   : > { %v1648_v34 = vld [vmem:[%s1763_s11 + $0x40] ss:$8 sps:$4 sm:$0xff]   ;;  %v1650_v36 = vld [vmem:[%s1763_s11 + $0x54] ss:$8 sps:$4 sm:$0xff]   ;;  %v1654_v38 = vld [vmem:[%s1763_s11 + $0x50] ss:$8 sps:$4 sm:$0xff]  }
  0x18   : > { %1461 = vmatpush3.bf16.msra.mxu0 %v1613_v9  ;;  %1576 = vmatpush3.bf16.msra.mxu1 %v1613_v9  ;;  %v1649_v35 = vld [vmem:[%s1763_s11 + $0xc0] ss:$8 sps:$4 sm:$0xff]   ;;  %v1652_v37 = vld [vmem:[%s1763_s11 + $0xd4] ss:$8 sps:$4 sm:$0xff]   ;;  %v1655_v39 = vld [vmem:[%s1763_s11 + $0xd0] ss:$8 sps:$4 sm:$0xff]  }
  0x19   : > { %1462 = vmatprep.subr.bf16.mxu0 %v1614_v10  ;;  %1569 = vmatprep.subr.bf16.mxu1 %v1614_v10  ;;  %v1656_v40 = vld [vmem:[%s1763_s11 + $0x64] ss:$8 sps:$4 sm:$0xff]   ;;  %v1660_v42 = vld [vmem:[%s1763_s11 + $0x60] ss:$8 sps:$4 sm:$0xff]   ;;  %v1662_v44 = vld [vmem:[%s1763_s11 + $0x74] ss:$8 sps:$4 sm:$0xff]  }
  0x1a   : > { %v1658_v41 = vld [vmem:[%s1763_s11 + $0xe4] ss:$8 sps:$4 sm:$0xff]   ;;  %v1661_v43 = vld [vmem:[%s1763_s11 + $0xe0] ss:$8 sps:$4 sm:$0xff]   ;;  %v1664_v45 = vld [vmem:[%s1763_s11 + $0xf4] ss:$8 sps:$4 sm:$0xff]  }
  0x1b   : > { %v1666_v46 = vld [vmem:[%s1763_s11 + $0x70] ss:$8 sps:$4 sm:$0xff]  }
  0x1c   : > { %1463 = vmatpush3.bf16.msra.mxu0 %v1615_v13  ;;  %1577 = vmatpush3.bf16.msra.mxu1 %v1615_v13  ;;  %v1667_v47 = vld [vmem:[%s1763_s11 + $0xf0] ss:$8 sps:$4 sm:$0xff]  }
  0x1d   : > { %1464 = vmatprep.subr.bf16.mxu0 %v1616_v14  ;;  %1570 = vmatprep.subr.bf16.mxu1 %v1616_v14 }
  0x20   : > { %1465 = vmatpush3.bf16.msra.mxu0 %v1617_v15  ;;  %1578 = vmatpush3.bf16.msra.mxu1 %v1617_v15 }
  0x21   : > { %1466 = vmatprep.subr.bf16.mxu0 %v1618_v16  ;;  %1571 = vmatprep.subr.bf16.mxu1 %v1618_v16 }
  0x24   : > { %1467 = vmatpush3.bf16.msra.mxu0 %v1619_v17  ;;  %1579 = vmatpush3.bf16.msra.mxu1 %v1619_v17 }
  0x27   : > { %689 = vmatmul.mubr.bf16.vlgmr.msra.gmra.mrb[0].mxu0 %v1620_v18  ;;  %753 = vmatmul.mubr.bf16.vlgmr.msra.gmra.mrb[0].mxu1 %v1623_v19 }
  0x28   : > { %696 = vmatprep.mubr.bf16.mxu0 %v1626_v20  ;;  %760 = vmatprep.mubr.bf16.mxu1 %v1628_v21 }
  0x2f   : > { %697 = vmatmul.mubr.bf16.gmra.mrb[4].mxu0 %v1630_v22  ;;  %761 = vmatmul.mubr.bf16.gmra.mrb[4].mxu1 %v1631_v23 }
  0x30   : > { %704 = vmatprep.mubr.bf16.mxu0 %v1632_v24  ;;  %768 = vmatprep.mubr.bf16.mxu1 %v1634_v25 }
  0x37   : > { %705 = vmatmul.mubr.bf16.gmra.mrb[8].mxu0 %v1636_v26  ;;  %769 = vmatmul.mubr.bf16.gmra.mrb[8].mxu1 %v1637_v27 }
  0x38   : > { %712 = vmatprep.mubr.bf16.mxu0 %v1638_v28  ;;  %776 = vmatprep.mubr.bf16.mxu1 %v1640_v29 }
  0x3f   : > { %713 = vmatmul.mubr.bf16.gmra.mrb[12].mxu0 %v1642_v30  ;;  %777 = vmatmul.mubr.bf16.gmra.mrb[12].mxu1 %v1643_v31 }
  0x40   : > { %720 = vmatprep.mubr.bf16.mxu0 %v1644_v32  ;;  %784 = vmatprep.mubr.bf16.mxu1 %v1646_v33 }
  0x47   : > { %721 = vmatmul.mubr.bf16.gmra.mrb[16].mxu0 %v1648_v34  ;;  %785 = vmatmul.mubr.bf16.gmra.mrb[16].mxu1 %v1649_v35 }
  0x48   : > { %728 = vmatprep.mubr.bf16.mxu0 %v1650_v36  ;;  %792 = vmatprep.mubr.bf16.mxu1 %v1652_v37 }
  0x4f   : > { %729 = vmatmul.mubr.bf16.gmra.mrb[20].mxu0 %v1654_v38  ;;  %793 = vmatmul.mubr.bf16.gmra.mrb[20].mxu1 %v1655_v39 }
  0x50   : > { %736 = vmatprep.mubr.bf16.mxu0 %v1656_v40  ;;  %800 = vmatprep.mubr.bf16.mxu1 %v1658_v41 }
  0x57   : > { %737 = vmatmul.mubr.bf16.gmra.mrb[24].mxu0 %v1660_v42  ;;  %801 = vmatmul.mubr.bf16.gmra.mrb[24].mxu1 %v1661_v43 }
  0x58   : > { %744 = vmatprep.mubr.bf16.mxu0 %v1662_v44  ;;  %808 = vmatprep.mubr.bf16.mxu1 %v1664_v45 }
  0x5f   : > { %745 = vmatmul.mubr.bf16.gmra.mrb[28].mxu0 %v1666_v46  ;;  %809 = vmatmul.mubr.bf16.gmra.mrb[28].mxu1 %v1667_v47 }
  0xfa   : > { %v1468_v48 = vpop.f32.mrb[0].mxu0  ;;  %v1516_v49 = vpop.f32.mrb[0].mxu1 }
  0xfb   : > { %v1469_v50 = vpop.f32.mrb[1].mxu0  ;;  %v1517_v51 = vpop.f32.mrb[1].mxu1 }
  0xfc   : > { %v1470_v52 = vadd.f32 %v1469_v50, %v1468_v48  ;;  %v1518_v53 = vadd.f32 %v1517_v51, %v1516_v49  ;;  %v1471_v54 = vpop.f32.mrb[2].mxu0  ;;  %v1519_v55 = vpop.f32.mrb[2].mxu1 }
  0xfd   : > { %v1472_v57 = vpop.f32.mrb[3].mxu0  ;;  %v1520_v58 = vpop.f32.mrb[3].mxu1 }
  0xfe   : > { %v1473_v59 = vadd.f32 %v1472_v57, %v1471_v54  ;;  %v1521_v60 = vadd.f32 %v1520_v58, %v1519_v55  ;;  %v923_v61 = vadd.f32 %v1470_v52, %v1821_v56  ;;  %v939_v62 = vadd.f32 %v1518_v53, %v1821_v56 }
 0x100   : > { %v924_v63 = vadd.f32 %v1473_v59, %v1821_v56  ;;  %v940_v0 = vadd.f32 %v1521_v60, %v1821_v56 }
 0x102   : > { %v1360_v1 = vpack.c.bf16 %v924_v63, %v923_v61  ;;  %v1400_v2 = vpack.c.bf16 %v940_v0, %v939_v62  ;;  %v1474_v3 = vpop.f32.mrb[4].mxu0  ;;  %v1522_v4 = vpop.f32.mrb[4].mxu1 }
 0x103   : > { %v1475_v5 = vpop.f32.mrb[5].mxu0  ;;  %v1523_v6 = vpop.f32.mrb[5].mxu1 }
 0x104   : > { %1361 = vst [vmem:[%s1831_s8] sm:$0xff] %v1360_v1   ;;  %1444 = vst [vmem:[%s1831_s8 + $0x40] sm:$0xff] %v1400_v2   ;;  %v1476_v7 = vadd.f32 %v1475_v5, %v1474_v3  ;;  %v1524_v8 = vadd.f32 %v1523_v6, %v1522_v4  ;;  %v1477_v9 = vpop.f32.mrb[6].mxu0  ;;  %v1525_v10 = vpop.f32.mrb[6].mxu1 }
 0x105   : > { %v1478_v11 = vpop.f32.mrb[7].mxu0  ;;  %v1526_v12 = vpop.f32.mrb[7].mxu1 }
 0x106   : > { %v1479_v13 = vadd.f32 %v1478_v11, %v1477_v9  ;;  %v1527_v14 = vadd.f32 %v1526_v12, %v1525_v10  ;;  %v925_v15 = vadd.f32 %v1476_v7, %v1821_v56  ;;  %v941_v16 = vadd.f32 %v1524_v8, %v1821_v56 }
 0x108   : > { %v926_v17 = vadd.f32 %v1479_v13, %v1821_v56  ;;  %v942_v18 = vadd.f32 %v1527_v14, %v1821_v56 }
 0x10a   : > { %v1365_v19 = vpack.c.bf16 %v926_v17, %v925_v15  ;;  %v1405_v20 = vpack.c.bf16 %v942_v18, %v941_v16  ;;  %v1480_v21 = vpop.f32.mrb[8].mxu0  ;;  %v1528_v22 = vpop.f32.mrb[8].mxu1 }
 0x10b   : > { %v1481_v23 = vpop.f32.mrb[9].mxu0  ;;  %v1529_v24 = vpop.f32.mrb[9].mxu1 }
 0x10c   : > { %1437 = vst [vmem:[%s1831_s8 + $0x8] sm:$0xff] %v1365_v19   ;;  %1445 = vst [vmem:[%s1831_s8 + $0x48] sm:$0xff] %v1405_v20   ;;  %v1482_v25 = vadd.f32 %v1481_v23, %v1480_v21  ;;  %v1530_v26 = vadd.f32 %v1529_v24, %v1528_v22  ;;  %v1483_v27 = vpop.f32.mrb[10].mxu0  ;;  %v1531_v28 = vpop.f32.mrb[10].mxu1 }
 0x10d   : > { %v1484_v29 = vpop.f32.mrb[11].mxu0  ;;  %v1532_v30 = vpop.f32.mrb[11].mxu1 }
 0x10e   : > { %v1485_v31 = vadd.f32 %v1484_v29, %v1483_v27  ;;  %v1533_v32 = vadd.f32 %v1532_v30, %v1531_v28  ;;  %v927_v33 = vadd.f32 %v1482_v25, %v1821_v56  ;;  %v943_v34 = vadd.f32 %v1530_v26, %v1821_v56 }
 0x110   : > { %v928_v35 = vadd.f32 %v1485_v31, %v1821_v56  ;;  %v944_v36 = vadd.f32 %v1533_v32, %v1821_v56 }
 0x112   : > { %v1370_v37 = vpack.c.bf16 %v928_v35, %v927_v33  ;;  %v1410_v38 = vpack.c.bf16 %v944_v36, %v943_v34  ;;  %v1486_v39 = vpop.f32.mrb[12].mxu0  ;;  %v1534_v40 = vpop.f32.mrb[12].mxu1 }
 0x113   : > { %v1487_v41 = vpop.f32.mrb[13].mxu0  ;;  %v1535_v42 = vpop.f32.mrb[13].mxu1 }
 0x114   : > { %1438 = vst [vmem:[%s1831_s8 + $0x10] sm:$0xff] %v1370_v37   ;;  %1446 = vst [vmem:[%s1831_s8 + $0x50] sm:$0xff] %v1410_v38   ;;  %v1488_v43 = vadd.f32 %v1487_v41, %v1486_v39  ;;  %v1536_v44 = vadd.f32 %v1535_v42, %v1534_v40  ;;  %v1489_v45 = vpop.f32.mrb[14].mxu0  ;;  %v1537_v46 = vpop.f32.mrb[14].mxu1 }
 0x115   : > { %v1490_v47 = vpop.f32.mrb[15].mxu0  ;;  %v1538_v48 = vpop.f32.mrb[15].mxu1 }
 0x116   : > { %v1491_v49 = vadd.f32 %v1490_v47, %v1489_v45  ;;  %v1539_v50 = vadd.f32 %v1538_v48, %v1537_v46  ;;  %v929_v51 = vadd.f32 %v1488_v43, %v1821_v56  ;;  %v945_v52 = vadd.f32 %v1536_v44, %v1821_v56 }
 0x118   : > { %v930_v53 = vadd.f32 %v1491_v49, %v1821_v56  ;;  %v946_v54 = vadd.f32 %v1539_v50, %v1821_v56 }
 0x11a   : > { %v1375_v55 = vpack.c.bf16 %v930_v53, %v929_v51  ;;  %v1415_v57 = vpack.c.bf16 %v946_v54, %v945_v52  ;;  %v1492_v58 = vpop.f32.mrb[16].mxu0  ;;  %v1540_v59 = vpop.f32.mrb[16].mxu1 }
 0x11b   : > { %v1493_v60 = vpop.f32.mrb[17].mxu0  ;;  %v1541_v61 = vpop.f32.mrb[17].mxu1 }
 0x11c   : > { %1439 = vst [vmem:[%s1831_s8 + $0x18] sm:$0xff] %v1375_v55   ;;  %1447 = vst [vmem:[%s1831_s8 + $0x58] sm:$0xff] %v1415_v57   ;;  %v1494_v62 = vadd.f32 %v1493_v60, %v1492_v58  ;;  %v1542_v63 = vadd.f32 %v1541_v61, %v1540_v59  ;;  %v1495_v0 = vpop.f32.mrb[18].mxu0  ;;  %v1543_v1 = vpop.f32.mrb[18].mxu1 }
 0x11d   : > { %v1496_v2 = vpop.f32.mrb[19].mxu0  ;;  %v1544_v3 = vpop.f32.mrb[19].mxu1 }
 0x11e   : > { %v1497_v4 = vadd.f32 %v1496_v2, %v1495_v0  ;;  %v1545_v5 = vadd.f32 %v1544_v3, %v1543_v1  ;;  %v931_v6 = vadd.f32 %v1494_v62, %v1821_v56  ;;  %v947_v7 = vadd.f32 %v1542_v63, %v1821_v56 }
 0x120   : > { %v932_v8 = vadd.f32 %v1497_v4, %v1821_v56  ;;  %v948_v9 = vadd.f32 %v1545_v5, %v1821_v56 }
 0x122   : > { %v1380_v10 = vpack.c.bf16 %v932_v8, %v931_v6  ;;  %v1420_v11 = vpack.c.bf16 %v948_v9, %v947_v7  ;;  %v1498_v12 = vpop.f32.mrb[20].mxu0  ;;  %v1546_v13 = vpop.f32.mrb[20].mxu1 }
 0x123   : > { %v1499_v14 = vpop.f32.mrb[21].mxu0  ;;  %v1547_v15 = vpop.f32.mrb[21].mxu1 }
 0x124   : > { %1440 = vst [vmem:[%s1831_s8 + $0x20] sm:$0xff] %v1380_v10   ;;  %1448 = vst [vmem:[%s1831_s8 + $0x60] sm:$0xff] %v1420_v11   ;;  %v1500_v16 = vadd.f32 %v1499_v14, %v1498_v12  ;;  %v1548_v17 = vadd.f32 %v1547_v15, %v1546_v13  ;;  %v1501_v18 = vpop.f32.mrb[22].mxu0  ;;  %v1549_v19 = vpop.f32.mrb[22].mxu1 }
 0x125   : > { %v1502_v20 = vpop.f32.mrb[23].mxu0  ;;  %v1550_v21 = vpop.f32.mrb[23].mxu1 }
 0x126   : > { %v1503_v22 = vadd.f32 %v1502_v20, %v1501_v18  ;;  %v1551_v23 = vadd.f32 %v1550_v21, %v1549_v19  ;;  %v933_v24 = vadd.f32 %v1500_v16, %v1821_v56  ;;  %v949_v25 = vadd.f32 %v1548_v17, %v1821_v56 }
 0x128   : > { %v934_v26 = vadd.f32 %v1503_v22, %v1821_v56  ;;  %v950_v27 = vadd.f32 %v1551_v23, %v1821_v56 }
 0x12a   : > { %v1385_v28 = vpack.c.bf16 %v934_v26, %v933_v24  ;;  %v1425_v29 = vpack.c.bf16 %v950_v27, %v949_v25  ;;  %v1504_v30 = vpop.f32.mrb[24].mxu0  ;;  %v1552_v31 = vpop.f32.mrb[24].mxu1 }
 0x12b   : > { %v1505_v32 = vpop.f32.mrb[25].mxu0  ;;  %v1553_v33 = vpop.f32.mrb[25].mxu1 }
 0x12c   : > { %1441 = vst [vmem:[%s1831_s8 + $0x28] sm:$0xff] %v1385_v28   ;;  %1449 = vst [vmem:[%s1831_s8 + $0x68] sm:$0xff] %v1425_v29   ;;  %v1506_v34 = vadd.f32 %v1505_v32, %v1504_v30  ;;  %v1554_v35 = vadd.f32 %v1553_v33, %v1552_v31  ;;  %v1507_v36 = vpop.f32.mrb[26].mxu0  ;;  %v1555_v37 = vpop.f32.mrb[26].mxu1 }
 0x12d   : > { %v1508_v38 = vpop.f32.mrb[27].mxu0  ;;  %v1556_v39 = vpop.f32.mrb[27].mxu1 }
 0x12e   : > { %v1509_v40 = vadd.f32 %v1508_v38, %v1507_v36  ;;  %v1557_v41 = vadd.f32 %v1556_v39, %v1555_v37  ;;  %v935_v42 = vadd.f32 %v1506_v34, %v1821_v56  ;;  %v951_v43 = vadd.f32 %v1554_v35, %v1821_v56 }
 0x130   : > { %v936_v44 = vadd.f32 %v1509_v40, %v1821_v56  ;;  %v952_v45 = vadd.f32 %v1557_v41, %v1821_v56 }
 0x132   : > { %v1390_v46 = vpack.c.bf16 %v936_v44, %v935_v42  ;;  %v1430_v47 = vpack.c.bf16 %v952_v45, %v951_v43  ;;  %v1510_v48 = vpop.f32.mrb[28].mxu0  ;;  %v1558_v49 = vpop.f32.mrb[28].mxu1 }
 0x133   : > { %v1511_v50 = vpop.f32.mrb[29].mxu0  ;;  %v1559_v51 = vpop.f32.mrb[29].mxu1 }
 0x134   : > { %1442 = vst [vmem:[%s1831_s8 + $0x30] sm:$0xff] %v1390_v46   ;;  %1450 = vst [vmem:[%s1831_s8 + $0x70] sm:$0xff] %v1430_v47   ;;  %v1512_v52 = vadd.f32 %v1511_v50, %v1510_v48  ;;  %v1560_v53 = vadd.f32 %v1559_v51, %v1558_v49  ;;  %v1513_v54 = vpop.f32.mrb[30].mxu0  ;;  %v1561_v55 = vpop.f32.mrb[30].mxu1 }
 0x135   : > { %v1514_v57 = vpop.f32.mrb[31].mxu0  ;;  %v1562_v58 = vpop.f32.mrb[31].mxu1 }
 0x136   : > { %v1515_v59 = vadd.f32 %v1514_v57, %v1513_v54  ;;  %v1563_v60 = vadd.f32 %v1562_v58, %v1561_v55  ;;  %v937_v61 = vadd.f32 %v1512_v52, %v1821_v56  ;;  %v953_v62 = vadd.f32 %v1560_v53, %v1821_v56 }
 0x138   : > { %v938_v63 = vadd.f32 %v1515_v59, %v1821_v56  ;;  %v954_v0 = vadd.f32 %v1563_v60, %v1821_v56 }
 0x13a   : > { %v1395_v1 = vpack.c.bf16 %v938_v63, %v937_v61  ;;  %v1435_v2 = vpack.c.bf16 %v954_v0, %v953_v62 }
 0x13c   : > { %1443 = vst [vmem:[%s1831_s8 + $0x38] sm:$0xff] %v1395_v1   ;;  %1451 = vst [vmem:[%s1831_s8 + $0x78] sm:$0xff] %v1435_v2  }
 0x13d PF: > { %s13_s14 = sadd.s32 1, %s1690_s14   ;;  %s1890_s12 = smov %s1686_s13 }
 0x13e   : > { %p10_p5 = scmp.ge.s32.totalorder %s13_s14, 4   ;;  %s1891_s13 = smov %s1893_s15 }
 0x140   :  { %12 = sbr.rel (!%p10_p5) target bundleno = 2 (0x2), region = 76 }

</bundles_post_ra>
